<compile_context>
chip_gen: v6e
topology: v6e:2x2x1
jax: 0.10.0
libtpu: 0.0.40
codegen_flags: <defaults>
</compile_context>

<pallas_src>
import jax
import jax.numpy as jnp
from jax.experimental import pallas as pl
from jax.experimental.pallas import tpu as pltpu


def _round_up(x, m):
    return ((x + m - 1) // m) * m


def mlp_critic_kernel(xin_ref, w1t_ref, w2t_ref, w3t_ref, wct_ref,
                      bias_ref, scal_ref, mean_ref):
    hidden, obs_dim = w1t_ref.shape
    latent = w3t_ref.shape[0]

    x = xin_ref[0:obs_dim, :]                     # (obs_dim, bt)  obs rows
    a = xin_ref[obs_dim:obs_dim + 1, :]           # (1, bt)        action row

    # hidden base, fully transposed: H.T = tanh(W.T @ X.T + b[:, None]); batch on lanes.
    h1 = jnp.tanh(jnp.dot(w1t_ref[...], x, preferred_element_type=jnp.float32)
                  + bias_ref[0:hidden, 0:1])
    h2 = jnp.tanh(jnp.dot(w2t_ref[...], h1, preferred_element_type=jnp.float32)
                  + bias_ref[0:hidden, 1:2])
    z = jnp.tanh(jnp.dot(w3t_ref[...], h2, preferred_element_type=jnp.float32)
                 + bias_ref[0:latent, 2:3])

    # critic head: cat([z, a], -1) @ wc + bc  ==  wc_z.T @ z + wc_a * a + bc
    mean = (jnp.dot(wct_ref[...], z, preferred_element_type=jnp.float32)
            + a * scal_ref[0] + scal_ref[1])      # (1, bt) lane-dense
    mean_ref[...] = mean.astype(mean_ref.dtype)


def prepare_params(params):
    """One-time parameter repacking (outside the per-call hot path)."""
    w1, b1, w2, b2, w3, b3, wc, bc, logstd = params
    obs_dim, hidden = w1.shape
    latent = w3.shape[1]
    hmax = max(hidden, latent)

    w1t = jnp.asarray(w1, jnp.float32).T          # (hidden, obs_dim)
    w2t = jnp.asarray(w2, jnp.float32).T          # (hidden, hidden)
    w3t = jnp.asarray(w3, jnp.float32).T          # (latent, hidden)
    wct = jnp.asarray(wc[:latent, :], jnp.float32).T   # (1, latent)
    wc_a = wc[latent, 0]                          # scalar action-column weight
    scalars = jnp.stack([wc_a, bc.reshape(())]).astype(jnp.float32)   # (2,) -> SMEM

    # biases stacked as columns so each broadcasts along lanes as (rows, 1)
    bias_stack = jnp.zeros((hmax, 3), jnp.float32)
    bias_stack = bias_stack.at[:hidden, 0].set(b1)
    bias_stack = bias_stack.at[:hidden, 1].set(b2)
    bias_stack = bias_stack.at[:latent, 2].set(b3)

    return (w1t, w2t, w3t, wct, bias_stack, scalars, jnp.asarray(logstd, jnp.float32))


def mlp_critic_forward(obs, actions, prepared, *, max_batch_tile=2048):
    """Returns (mean, std) of the critic-head DiagGaussian."""
    w1t, w2t, w3t, wct, bias_stack, scalars, logstd = prepared
    assert actions.shape[-1] == 1, "kernel specializes action_dim == 1 (Box(shape=(1,)))"

    B, obs_dim = obs.shape
    hidden = w1t.shape[0]
    latent = w3t.shape[0]
    hmax = bias_stack.shape[0]
    in_rows = obs_dim + 1

    # Batch tile: multiple of 128 (lane-dense), large by default, but capped near
    # ceil(B/2) so big batches split into >=2 grid steps (v7x megacore sharding).
    bt = max(128, min(max_batch_tile, _round_up(pl.cdiv(B, 2), 128)))
    n_tiles = pl.cdiv(B, bt)
    Bp = n_tiles * bt

    # Fold actions into obs as one extra column, pad the batch, transpose to
    # batch-in-lanes layout (in_rows, Bp).
    xin = jnp.concatenate([obs.astype(jnp.float32),
                           actions.astype(jnp.float32)], axis=-1)
    if Bp != B:
        xin = jnp.pad(xin, ((0, Bp - B), (0, 0)))
    xin_t = xin.T                                  # (obs_dim+1, Bp)

    # VMEM budget: double-buffered I/O tiles, single-buffered resident weights,
    # live f32 activations; generous headroom, clamped to [8 MiB, 32 MiB].
    weight_bytes = 4 * (hidden * obs_dim + hidden * hidden + latent * hidden
                        + latent + 3 * hmax)
    tile_io_bytes = 4 * bt * (in_rows + 1)
    act_bytes = 4 * bt * (2 * hidden + latent)
    vmem_limit = int(min(32 * 1024 * 1024,
                         max(8 * 1024 * 1024,
                             4 * (2 * tile_io_bytes + weight_bytes + act_bytes))))

    cost = pl.CostEstimate(
        flops=2 * Bp * (obs_dim * hidden + hidden * hidden + hidden * latent + latent)
              + 3 * Bp,
        transcendentals=Bp * (2 * hidden + latent),
        bytes_accessed=4 * (Bp * in_rows + Bp) + weight_bytes + 8,
    )

    mean_t = pl.pallas_call(
        mlp_critic_kernel,
        out_shape=jax.ShapeDtypeStruct((1, Bp), jnp.float32),
        grid=(n_tiles,),
        in_specs=[
            pl.BlockSpec((in_rows, bt), lambda i: (0, i)),          # [obs|act].T tile
            pl.BlockSpec((hidden, obs_dim), lambda i: (0, 0)),      # W1.T (resident)
            pl.BlockSpec((hidden, hidden), lambda i: (0, 0)),       # W2.T (resident)
            pl.BlockSpec((latent, hidden), lambda i: (0, 0)),       # W3.T (resident)
            pl.BlockSpec((1, latent), lambda i: (0, 0)),            # wc_z.T (resident)
            pl.BlockSpec((hmax, 3), lambda i: (0, 0)),              # stacked biases
            pl.BlockSpec(memory_space=pltpu.MemorySpace.SMEM),      # [wc_a, bc] scalars
        ],
        out_specs=pl.BlockSpec((1, bt), lambda i: (0, i)),          # lane-dense mean.T
        compiler_params=pltpu.CompilerParams(
            dimension_semantics=("parallel",),
            vmem_limit_bytes=vmem_limit,
        ),
        cost_estimate=cost,
    )(xin_t, w1t, w2t, w3t, wct, bias_stack, scalars)

    mean = mean_t[0, :B].reshape(B, 1)
    # std is batch-independent; compute/broadcast it in the wrapper.
    std = jnp.broadcast_to(jnp.exp(logstd).reshape(1, 1), (B, 1))
    return mean, std


def init_params(key, obs_dim, hidden, latent):
    ks = jax.random.split(key, 4)

    def lin(k, fan_in, fan_out):
        w = jax.random.normal(k, (fan_in, fan_out), jnp.float32) * (1.0 / jnp.sqrt(fan_in))
        b = jnp.zeros((fan_out,), jnp.float32)
        return w, b

    w1, b1 = lin(ks[0], obs_dim, hidden)
    w2, b2 = lin(ks[1], hidden, hidden)
    w3, b3 = lin(ks[2], hidden, latent)
    wc, bc = lin(ks[3], latent + 1, 1)
    logstd = jnp.zeros((1, 1), jnp.float32)
    return (w1, b1, w2, b2, w3, b3, wc, bc, logstd)


def reference_forward(obs, actions, params):
    w1, b1, w2, b2, w3, b3, wc, bc, logstd = params
    h = jnp.tanh(obs @ w1 + b1)
    h = jnp.tanh(h @ w2 + b2)
    z = jnp.tanh(h @ w3 + b3)
    feats = jnp.concatenate([z, actions], axis=-1)
    mean = feats @ wc + bc
    std = jnp.broadcast_to(jnp.exp(logstd), mean.shape)
    return mean, std


if __name__ == "__main__":
    OBS_DIM, HIDDEN, LATENT = 16, 32, 32          # action_space = Box(shape=(1,))
    key = jax.random.PRNGKey(0)
    k_obs, k_act, k_param = jax.random.split(key, 3)
    params = init_params(k_param, OBS_DIM, HIDDEN, LATENT)
    prepared = prepare_params(params)             # one-time repack (hoisted off hot path)

    def check(B):
        obs = jax.random.normal(jax.random.fold_in(k_obs, B), (B, OBS_DIM), jnp.float32)
        actions = jax.random.normal(jax.random.fold_in(k_act, B), (B, 1), jnp.float32)
        mean, std = mlp_critic_forward(obs, actions, prepared)
        jax.block_until_ready((mean, std))
        mean_ref, std_ref = reference_forward(obs, actions, params)
        assert mean.shape == (B, 1) and std.shape == (B, 1)
        assert jnp.allclose(mean, mean_ref, atol=1e-5, rtol=1e-5)
        assert jnp.allclose(std, std_ref, atol=1e-6, rtol=1e-6)

    check(8)      # small batch (single padded tile)
    check(13)     # uneven batch (padding + slice-back)
    check(300)    # multi-tile grid (2 tiles of 256, exercises parallel batch axis)

    print("KERNEL_OK")
</pallas_src>

<mosaic_0001>
module attributes {stable_mosaic.version = 11 : i64} {
  func.func @mlp_critic_kernel(%arg0: i32, %arg1: memref<17x128xf32, #tpu.memory_space<vmem>>, %arg2: memref<32x16xf32, #tpu.memory_space<vmem>>, %arg3: memref<32x32xf32, #tpu.memory_space<vmem>>, %arg4: memref<32x32xf32, #tpu.memory_space<vmem>>, %arg5: memref<1x32xf32, #tpu.memory_space<vmem>>, %arg6: memref<32x3xf32, #tpu.memory_space<vmem>>, %arg7: memref<2xf32, #tpu.memory_space<smem>>, %arg8: memref<1x128xf32, #tpu.memory_space<vmem>>) attributes {dimension_semantics = [#tpu.dimension_semantics<parallel>], iteration_bounds = array<i64: 1>, scalar_prefetch = 0 : i64, scratch_operands = 0 : i64, tpu.core_type = #tpu.core_type<tc>, window_params = [{transform_indices = @transform_0, window_bounds = array<i64: 17, 128>}, {pipeline_mode = #tpu.pipeline_mode<synchronous>, transform_indices = @transform_1, window_bounds = array<i64: 32, 16>}, {pipeline_mode = #tpu.pipeline_mode<synchronous>, transform_indices = @transform_2, window_bounds = array<i64: 32, 32>}, {pipeline_mode = #tpu.pipeline_mode<synchronous>, transform_indices = @transform_3, window_bounds = array<i64: 32, 32>}, {pipeline_mode = #tpu.pipeline_mode<synchronous>, transform_indices = @transform_4, window_bounds = array<i64: 1, 32>}, {pipeline_mode = #tpu.pipeline_mode<synchronous>, transform_indices = @transform_5, window_bounds = array<i64: 32, 3>}, {transform_indices = @transform_6, window_bounds = array<i64: 2>}, {transform_indices = @transform_7, window_bounds = array<i64: 1, 128>}]} {
    %c0 = arith.constant 0 : index
    %c0_0 = arith.constant 0 : index
    %0 = vector.load %arg1[%c0, %c0_0] : memref<17x128xf32, #tpu.memory_space<vmem>>, vector<16x128xf32>
    %c16 = arith.constant 16 : index
    %c0_1 = arith.constant 0 : index
    %1 = vector.load %arg1[%c16, %c0_1] : memref<17x128xf32, #tpu.memory_space<vmem>>, vector<1x128xf32>
    %c0_2 = arith.constant 0 : index
    %c0_3 = arith.constant 0 : index
    %2 = vector.load %arg2[%c0_2, %c0_3] : memref<32x16xf32, #tpu.memory_space<vmem>>, vector<32x16xf32>
    %cst = arith.constant dense<0.000000e+00> : vector<32x128xf32>
    %3 = tpu.matmul %2, %0, %cst {dimension_numbers = #tpu.dot_dimension_numbers<[1], [0], [0], [1], [0, 0, 1, 1], [], []>} : vector<32x16xf32>, vector<16x128xf32>, vector<32x128xf32> -> vector<32x128xf32>
    %c0_4 = arith.constant 0 : index
    %c0_5 = arith.constant 0 : index
    %4 = vector.load %arg6[%c0_4, %c0_5] : memref<32x3xf32, #tpu.memory_space<vmem>>, vector<32x1xf32>
    %5 = vector.broadcast %4 : vector<32x1xf32> to vector<32x128xf32>
    %6 = arith.addf %3, %5 : vector<32x128xf32>
    %7 = math.tanh %6 : vector<32x128xf32>
    %c0_6 = arith.constant 0 : index
    %c0_7 = arith.constant 0 : index
    %8 = vector.load %arg3[%c0_6, %c0_7] : memref<32x32xf32, #tpu.memory_space<vmem>>, vector<32x32xf32>
    %cst_8 = arith.constant dense<0.000000e+00> : vector<32x128xf32>
    %9 = tpu.matmul %8, %7, %cst_8 {dimension_numbers = #tpu.dot_dimension_numbers<[1], [0], [0], [1], [0, 0, 1, 1], [], []>} : vector<32x32xf32>, vector<32x128xf32>, vector<32x128xf32> -> vector<32x128xf32>
    %c0_9 = arith.constant 0 : index
    %c1 = arith.constant 1 : index
    %10 = vector.load %arg6[%c0_9, %c1] : memref<32x3xf32, #tpu.memory_space<vmem>>, vector<32x1xf32>
    %11 = vector.broadcast %10 : vector<32x1xf32> to vector<32x128xf32>
    %12 = arith.addf %9, %11 : vector<32x128xf32>
    %13 = math.tanh %12 : vector<32x128xf32>
    %c0_10 = arith.constant 0 : index
    %c0_11 = arith.constant 0 : index
    %14 = vector.load %arg4[%c0_10, %c0_11] : memref<32x32xf32, #tpu.memory_space<vmem>>, vector<32x32xf32>
    %cst_12 = arith.constant dense<0.000000e+00> : vector<32x128xf32>
    %15 = tpu.matmul %14, %13, %cst_12 {dimension_numbers = #tpu.dot_dimension_numbers<[1], [0], [0], [1], [0, 0, 1, 1], [], []>} : vector<32x32xf32>, vector<32x128xf32>, vector<32x128xf32> -> vector<32x128xf32>
    %c0_13 = arith.constant 0 : index
    %c2 = arith.constant 2 : index
    %16 = vector.load %arg6[%c0_13, %c2] : memref<32x3xf32, #tpu.memory_space<vmem>>, vector<32x1xf32>
    %17 = vector.broadcast %16 : vector<32x1xf32> to vector<32x128xf32>
    %18 = arith.addf %15, %17 : vector<32x128xf32>
    %19 = math.tanh %18 : vector<32x128xf32>
    %c0_14 = arith.constant 0 : index
    %c0_15 = arith.constant 0 : index
    %20 = vector.load %arg5[%c0_14, %c0_15] : memref<1x32xf32, #tpu.memory_space<vmem>>, vector<1x32xf32>
    %cst_16 = arith.constant dense<0.000000e+00> : vector<1x128xf32>
    %21 = tpu.matmul %20, %19, %cst_16 {dimension_numbers = #tpu.dot_dimension_numbers<[1], [0], [0], [1], [0, 0, 1, 1], [], []>} : vector<1x32xf32>, vector<32x128xf32>, vector<1x128xf32> -> vector<1x128xf32>
    %c0_17 = arith.constant 0 : index
    %22 = memref.load %arg7[%c0_17] : memref<2xf32, #tpu.memory_space<smem>>
    %23 = vector.broadcast %22 : f32 to vector<1x128xf32>
    %24 = arith.mulf %1, %23 : vector<1x128xf32>
    %25 = arith.addf %21, %24 : vector<1x128xf32>
    %c1_18 = arith.constant 1 : index
    %26 = memref.load %arg7[%c1_18] : memref<2xf32, #tpu.memory_space<smem>>
    %27 = vector.broadcast %26 : f32 to vector<1x128xf32>
    %28 = arith.addf %25, %27 : vector<1x128xf32>
    %c0_19 = arith.constant 0 : index
    %c0_20 = arith.constant 0 : index
    %29 = vector.load %arg8[%c0_19, %c0_20] : memref<1x128xf32, #tpu.memory_space<vmem>>, vector<1x128xf32>
    tpu.vector_store %arg8[%c0_19, %c0_20], %28 {strides = array<i32>} : memref<1x128xf32, #tpu.memory_space<vmem>>, vector<1x128xf32>,
    return
  }
  func.func @transform_0(%arg0: i32) -> (i32, i32) {
    %c0_i32 = arith.constant 0 : i32
    %c0_i32_0 = arith.constant 0 : i32
    return %c0_i32, %arg0 : i32, i32
  }
  func.func @transform_1(%arg0: i32) -> (i32, i32) {
    %c0_i32 = arith.constant 0 : i32
    %c0_i32_0 = arith.constant 0 : i32
    %c0_i32_1 = arith.constant 0 : i32
    return %c0_i32, %c0_i32_0 : i32, i32
  }
  func.func @transform_2(%arg0: i32) -> (i32, i32) {
    %c0_i32 = arith.constant 0 : i32
    %c0_i32_0 = arith.constant 0 : i32
    %c0_i32_1 = arith.constant 0 : i32
    return %c0_i32, %c0_i32_0 : i32, i32
  }
  func.func @transform_3(%arg0: i32) -> (i32, i32) {
    %c0_i32 = arith.constant 0 : i32
    %c0_i32_0 = arith.constant 0 : i32
    %c0_i32_1 = arith.constant 0 : i32
    return %c0_i32, %c0_i32_0 : i32, i32
  }
  func.func @transform_4(%arg0: i32) -> (i32, i32) {
    %c0_i32 = arith.constant 0 : i32
    %c0_i32_0 = arith.constant 0 : i32
    %c0_i32_1 = arith.constant 0 : i32
    return %c0_i32, %c0_i32_0 : i32, i32
  }
  func.func @transform_5(%arg0: i32) -> (i32, i32) {
    %c0_i32 = arith.constant 0 : i32
    %c0_i32_0 = arith.constant 0 : i32
    %c0_i32_1 = arith.constant 0 : i32
    return %c0_i32, %c0_i32_0 : i32, i32
  }
  func.func @transform_6(%arg0: i32) -> i32 {
    %c0_i32 = arith.constant 0 : i32
    %c0_i32_0 = arith.constant 0 : i32
    return %c0_i32 : i32
  }
  func.func @transform_7(%arg0: i32) -> (i32, i32) {
    %c0_i32 = arith.constant 0 : i32
    %c0_i32_0 = arith.constant 0 : i32
    return %c0_i32, %arg0 : i32, i32
  }
}

</mosaic_0001>

<bundles_post_ra>
// kernel: tpu_custom_call.1
= control target key start
LH: loop header
LB: loop body
LE: loop exit
PB: predicated region body
PF: predicated region fallthrough
CT: control target
= control target key end

     0   :  { %12 = vsyncpa [#allocation3], 0  ;;  %s848_s0 = inlined_call_operand.hbm [shape: f32[17,128], index: 0, kind: input, shape index: {}]   ;;  %s849_s1 = inlined_call_operand.vmem [shape: f32[32,16], index: 1, kind: input, shape index: {}]   ;;  %s850_s2 = inlined_call_operand.vmem [shape: f32[32,32], index: 2, kind: input, shape index: {}]   ;;  %s851_s3 = inlined_call_operand.vmem [shape: f32[32,32], index: 3, kind: input, shape index: {}]   ;;  %s852_s4 = inlined_call_operand.vmem [shape: f32[1,32], index: 4, kind: input, shape index: {}]   ;;  %s853_s5 = inlined_call_operand.vmem [shape: f32[32,3], index: 5, kind: input, shape index: {}]   ;;  %s854_s6 = inlined_call_operand.vmem [shape: f32[2], index: 6, kind: input, shape index: {}]   ;;  %s855_s7 = inlined_call_operand.hbm [shape: f32[1,128], index: 7, kind: output, shape index: {}]  }
   0x1   :  { %13 = vsyncpa [#allocation5], 0 }
   0x2   :  { %14 = vsyncpa [#allocation4], 0  ;;  %s715_s24 = smov [#allocation2]   ;;  %s43_s28 = sshll.u32 %s854_s6, 4  ;;  %s44_s28 = int_to_ptr.vmem [resolvable:$true] %s43_s28 }
   0x3   :  { %s20_s25 = sshll.u32 %s715_s24, 4  ;;  %s21_s25 = int_to_ptr.vmem [resolvable:$true] %s20_s25 }
   0x4   :  { %s665_s29 = scalar_lea.vmem %s21_s25, 384  ;;  %p670_p1 = scmp.lt.s32.totalorder %s21_s25, %s21_s25 }
   0x5   :  { %p666_p0 = scmp.ne.s32.totalorder %s21_s25, %s665_s29  ;;  %p671_p2 = scmp.lt.s32.totalorder %s665_s29, %s665_s29 }
   0x7   :  { %p672_p3 = por %p671_p2, %p670_p1 }
   0x9   :  { %p673_p4 = pnand %p672_p3, %p666_p0 }
   0xb   :  { %676 = shalt.err (!%p673_p4)
}
   0xc   :  { %s716_s30 = smov 128   ;;  %s717_s8 = smov 8  }
   0xd   :  { %26 = dma.hbm_to_vmem [thread:$0]  %s848_s0, 384, %s21_s25, [#allocation3], %s716_s30, %s716_s30, %s717_s8  }
   0xe   :  { %s677_s11 = scalar_lea.vmem %s44_s28, 16  ;;  %p682_p6 = scmp.lt.s32.totalorder %s44_s28, %s44_s28 }
   0xf   :  { %p678_p5 = scmp.ne.s32.totalorder %s44_s28, %s677_s11  ;;  %p683_p7 = scmp.lt.s32.totalorder %s677_s11, %s677_s11 }
  0x11   :  { %p684_p8 = por %p683_p7, %p682_p6 }
  0x13   :  { %p685_p9 = pnand %p684_p8, %p678_p5 }
  0x15   :  { %688 = shalt.err (!%p685_p9)
}
  0x16   :  { %s718_s6 = smov [#allocation6]  }
  0x17   :  { %46 = dma.vmem_to_smem %s44_s28, 16, %s718_s6, [#allocation5]  }
  0x18   :  { %709 = dma.done.wait [#allocation3], 384  }
  0x19   :  { %710 = vsyncadd [#allocation3], 4294966912 }
  0x1a   :  { %711 = dma.done.wait [#allocation5], 16  }
  0x1b   :  { %712 = vsyncadd [#allocation5], 4294967280 }
  0x1c   :  { %53 = sfence }
  0x1d   :  { %v55_v0 = vld [vmem:[#allocation2 + $0x8] sm:$0xff]  ;;  %v54_v1 = vld [vmem:[#allocation2] sm:$0xff]  ;;  %vm85_vm0 = vcmask 130048   ;;  %v719_v4 = vmov 0   ;;  %v781_v5 = vld [vmem:[%s853_s5 + $0x18] sm:$0xff]  ;;  %vm207_vm1 = vcmask 261120  }
  0x1e   :  { %v57_v2 = vld [vmem:[%s849_s1] sm:$0xff]  ;;  %568 = vmatprep.subr.mxu0 %v55_v0  ;;  %v58_v3 = vld [vmem:[%s849_s1 + $0x8] sm:$0xff]  ;;  %628 = vset.pattern.permute.xlu1 %v719_v4  ;;  %v59_v7 = vld [vmem:[%s849_s1 + $0x10] sm:$0xff]  ;;  %v720_v12 = vmov 1   ;;  %v721_v33 = vmov 2   ;;  %v722_v53 = vmov 0.0  }
  0x1f   :  { %572 = vmatprep.mubr.msk.f32.mxu0 %vm85_vm0, %v57_v2  ;;  %569 = vmatpush3.msra.mxu0 %v55_v0  ;;  %v786_v6 = vld [vmem:[%s853_s5 + $0x8] sm:$0xff]  ;;  %v63_v8 = vld [vmem:[%s853_s5 + $0x10] sm:$0xff]  ;;  %v60_v9 = vld [vmem:[%s849_s1 + $0x18] sm:$0xff]  ;;  %vm723_vm2 = vmmov 0   ;;  %s431_s16 = sld [smem:[#allocation6]]  ;;  %s724_s18 = smov [#allocation7]  }
  0x20   :  { %570 = vmatprep.subr.mxu0 %v54_v1  ;;  %627 = vset.pattern.permute.xlu0 %v719_v4  ;;  %v61_v10 = vld [vmem:[%s853_s5] sm:$0xff]  ;;  %v188_v29 = vld [vmem:[%s850_s2 + $0x8] sm:$0xff]  ;;  %v189_v30 = vld [vmem:[%s850_s2 + $0x10] sm:$0xff]  ;;  %s540_s17 = sld [smem:[#allocation6 + $0x1]]  ;;  %s517_s19 = sshll.u32 %s724_s18, 4  ;;  %s518_s19 = int_to_ptr.vmem [resolvable:$true] %s517_s19 }
  0x21   :  { %571 = vmatpush3.msra.mxu0 %v54_v1  ;;  %82 = vperm.xlu0 %627, %v781_v5   ;;  %v187_v11 = vld [vmem:[%s850_s2] sm:$0xff]  ;;  %v190_v31 = vld [vmem:[%s850_s2 + $0x18] sm:$0xff]  ;;  %v310_v50 = vld [vmem:[%s851_s3 + $0x8] sm:$0xff]  ;;  %s693_s20 = scalar_lea.vmem %s518_s19, 32  ;;  %p694_p11 = scmp.lt.s32.totalorder %s518_s19, %s518_s19 }
  0x22   :  { %573 = vmatmul.mubr.msk.f32.vlgmr.msra.gmra.mxu0 %vm85_vm0, %v58_v3  ;;  %72 = vperm.xlu1 %628, %v786_v6   ;;  %v309_v32 = vld [vmem:[%s851_s3] sm:$0xff]  ;;  %v311_v51 = vld [vmem:[%s851_s3 + $0x10] sm:$0xff]  ;;  %v312_v52 = vld [vmem:[%s851_s3 + $0x18] sm:$0xff] }
  0x23   :  { %575 = vmatprep.mubr.msk.f32.mxu0 %vm85_vm0, %v59_v7  ;;  %586 = vmatprep.mubr.msk.f32.mxu1 %vm207_vm1, %v187_v11  ;;  %v56_v7 = vld [vmem:[#allocation2 + $0x10] sm:$0x1] }
  0x25   :  { %77 = vperm.xlu0 %627, %v63_v8  }
  0x26   :  { %576 = vmatmul.mubr.msk.f32.gmra.mxu0 %vm85_vm0, %v60_v9  ;;  %67 = vperm.xlu1 %628, %v61_v10   ;;  %v508_v11 = vstv %s540_s17 }
  0x27   :  { %600 = vmatprep.mubr.msk.f32.mxu0 %vm207_vm1, %v309_v32 }
  0x29   :  { %629 = vset.pattern.permute.xlu0 %v720_v12 }
  0x2a   :  { %630 = vset.pattern.permute.xlu1 %v720_v12  ;;  %204 = vperm.xlu0 %629, %v781_v5  }
  0x2b   :  { %200 = vperm.xlu1 %630, %v63_v8  }
  0x2e   :  { %192 = vperm.xlu0 %629, %v61_v10  }
  0x2f   :  { %196 = vperm.xlu1 %630, %v786_v6  }
  0x32   :  { %632 = vset.pattern.permute.xlu0 %v721_v33 }
  0x33   :  { %631 = vset.pattern.permute.xlu1 %v721_v33  ;;  %322 = vperm.xlu0 %632, %v63_v8   ;;  %v432_v8 = vstv %s431_s16 }
  0x34   :  { %326 = vperm.xlu1 %631, %v781_v5   ;;  %v430_v5 = vld [vmem:[%s852_s4] sm:$0x1]  ;;  %v433_v9 = vmul.f32 %v432_v8, %v56_v7  ;;  %s689_s4 = scalar_lea.vmem %s518_s19, 16 }
  0x35   :  { %p690_p10 = scmp.ne.s32.totalorder %s518_s19, %s689_s4  ;;  %p695_p12 = scmp.lt.s32.totalorder %s693_s20, %s689_s4 }
  0x37   :  { %p696_p13 = por %p695_p12, %p694_p11 }
  0x38   :  { %318 = vperm.xlu1 %631, %v786_v6  }
  0x39   :  { %p697_p0 = pnand %p696_p13, %p690_p10 }
  0x3c   :  { %314 = vperm.xlu1 %631, %v61_v10  }
  0x9c   :  { %v83_v13 = vpop.permute.xlu0 %82 }
  0x9d   :  { %v73_v14 = vpop.permute.xlu1 %72 }
  0xa0   :  { %v78_v18 = vpop.permute.xlu0 %77 }
  0xa1   :  { %v68_v20 = vpop.permute.xlu1 %67 }
  0xa5   :  { %v205_v35 = vpop.permute.xlu0 %204 }
  0xa6   :  { %v201_v34 = vpop.permute.xlu1 %200 }
  0xa9   :  { %v193_v41 = vpop.permute.xlu0 %192 }
  0xaa   :  { %v197_v38 = vpop.permute.xlu1 %196 }
  0xae   :  { %v323_v59 = vpop.permute.xlu0 %322 }
  0xaf   :  { %v327_v54 = vpop.permute.xlu1 %326 }
  0xb3   :  { %v319_v55 = vpop.permute.xlu1 %318 }
  0xb7   :  { %v315_v61 = vpop.permute.xlu1 %314 }
  0xe2   :  { %v574_v15 = vpop.f32.mrf.mxu0 }
  0xe3   :  { %v170_v22 = vadd.f32 %v574_v15, %v73_v14 }
  0xe4   :  { %v164_v16 = vpop.f32.mrf.mxu0 }
  0xe5   :  { %v165_v24 = vadd.f32 %v164_v16, %v68_v20 }
  0xe6   :  { %v577_v17 = vpop.f32.mrf.mxu0 }
  0xe7   :  { %v180_v19 = vadd.f32 %v577_v17, %v83_v13 }
  0xe8   :  { %v174_v21 = vpop.f32.mrf.mxu0 }
  0xe9   :  { %633 = vtanh.f32 %v180_v19  ;;  %v175_v23 = vadd.f32 %v174_v21, %v78_v18 }
  0xeb   :  { %635 = vtanh.f32 %v175_v23 }
  0xec   :  { %637 = vtanh.f32 %v170_v22 }
  0xed   :  { %639 = vtanh.f32 %v165_v24 }
  0xf6   :  { %v634_v25 = vpop.eup %633 }
  0xf7   :  { %578 = vmatprep.subr.mxu1 %v634_v25 }
  0xf8   :  { %v636_v26 = vpop.eup %635  ;;  %579 = vmatpush3.msra.mxu1 %v634_v25 }
  0xf9   :  { %580 = vmatprep.subr.mxu1 %v636_v26  ;;  %v638_v27 = vpop.eup %637 }
  0xfa   :  { %581 = vmatpush3.msra.mxu1 %v636_v26  ;;  %v640_v28 = vpop.eup %639 }
  0xfb   :  { %582 = vmatprep.subr.mxu1 %v638_v27 }
  0xfc   :  { %583 = vmatpush3.msra.mxu1 %v638_v27 }
  0xfd   :  { %584 = vmatprep.subr.mxu1 %v640_v28 }
  0xfe   :  { %585 = vmatpush3.msra.mxu1 %v640_v28 }
  0xff   :  { %587 = vmatmul.mubr.msk.f32.vlgmr.msra.gmra.mxu1 %vm207_vm1, %v188_v29  ;;  %606 = vmatprep.subr.mxu1 %v722_v53 }
 0x100   :  { %589 = vmatprep.mubr.msk.f32.mxu1 %vm207_vm1, %v189_v30 }
 0x103   :  { %590 = vmatmul.mubr.msk.f32.gmra.mxu1 %vm207_vm1, %v190_v31 }
 0x104   :  { %614 = vmatprep.mubr.msk.f32.mxu1 %vm723_vm2, %v722_v53 }
 0x1bf   :  { %v588_v36 = vpop.f32.mrf.mxu1 }
 0x1c0   :  { %v292_v43 = vadd.f32 %v588_v36, %v197_v38 }
 0x1c1   :  { %v286_v37 = vpop.f32.mrf.mxu1 }
 0x1c2   :  { %v287_v45 = vadd.f32 %v286_v37, %v193_v41 }
 0x1c3   :  { %v591_v39 = vpop.f32.mrf.mxu1 }
 0x1c4   :  { %v302_v40 = vadd.f32 %v591_v39, %v205_v35 }
 0x1c5   :  { %v296_v42 = vpop.f32.mrf.mxu1 }
 0x1c6   :  { %641 = vtanh.f32 %v302_v40  ;;  %v297_v44 = vadd.f32 %v296_v42, %v201_v34 }
 0x1c8   :  { %643 = vtanh.f32 %v297_v44 }
 0x1c9   :  { %645 = vtanh.f32 %v292_v43 }
 0x1ca   :  { %647 = vtanh.f32 %v287_v45 }
 0x1d3   :  { %v642_v46 = vpop.eup %641 }
 0x1d4   :  { %592 = vmatprep.subr.mxu0 %v642_v46 }
 0x1d5   :  { %v644_v47 = vpop.eup %643  ;;  %593 = vmatpush3.msra.mxu0 %v642_v46 }
 0x1d6   :  { %594 = vmatprep.subr.mxu0 %v644_v47  ;;  %v646_v48 = vpop.eup %645 }
 0x1d7   :  { %595 = vmatpush3.msra.mxu0 %v644_v47  ;;  %v648_v49 = vpop.eup %647 }
 0x1d8   :  { %596 = vmatprep.subr.mxu0 %v646_v48 }
 0x1d9   :  { %597 = vmatpush3.msra.mxu0 %v646_v48 }
 0x1da   :  { %598 = vmatprep.subr.mxu0 %v648_v49 }
 0x1db   :  { %599 = vmatpush3.msra.mxu0 %v648_v49 }
 0x1dc   :  { %601 = vmatmul.mubr.msk.f32.vlgmr.msra.gmra.mxu0 %vm207_vm1, %v310_v50 }
 0x1dd   :  { %603 = vmatprep.mubr.msk.f32.mxu0 %vm207_vm1, %v311_v51 }
 0x1e0   :  { %604 = vmatmul.mubr.msk.f32.gmra.mxu0 %vm207_vm1, %v312_v52 }
 0x29c   :  { %v602_v56 = vpop.f32.mrf.mxu0 }
 0x29d   :  { %v413_v63 = vadd.f32 %v602_v56, %v319_v55 }
 0x29e   :  { %v407_v57 = vpop.f32.mrf.mxu0 }
 0x29f   :  { %v408_v1 = vadd.f32 %v407_v57, %v315_v61 }
 0x2a0   :  { %v605_v58 = vpop.f32.mrf.mxu0 }
 0x2a1   :  { %v423_v60 = vadd.f32 %v605_v58, %v327_v54 }
 0x2a2   :  { %v417_v62 = vpop.f32.mrf.mxu0 }
 0x2a3   :  { %649 = vtanh.f32 %v423_v60  ;;  %v418_v0 = vadd.f32 %v417_v62, %v323_v59 }
 0x2a5   :  { %651 = vtanh.f32 %v418_v0 }
 0x2a6   :  { %653 = vtanh.f32 %v413_v63 }
 0x2a7   :  { %655 = vtanh.f32 %v408_v1 }
 0x2b0   :  { %v650_v2 = vpop.eup %649 }
 0x2b1   :  { %607 = vmatpush3.msra.mxu1 %v650_v2 }
 0x2b2   :  { %v652_v3 = vpop.eup %651  ;;  %608 = vmatprep.subr.mxu1 %v722_v53 }
 0x2b3   :  { %609 = vmatpush3.msra.mxu1 %v652_v3  ;;  %v654_v4 = vpop.eup %653 }
 0x2b4   :  { %610 = vmatprep.subr.mxu1 %v722_v53  ;;  %v656_v6 = vpop.eup %655 }
 0x2b5   :  { %611 = vmatpush3.msra.mxu1 %v654_v4 }
 0x2b6   :  { %612 = vmatprep.subr.mxu1 %v722_v53 }
 0x2b7   :  { %613 = vmatpush3.msra.mxu1 %v656_v6 }
 0x2b8   :  { %615 = vmatmul.mubr.msk.f32.vlgmr.msra.gmra.mxu1 %vm207_vm1, %v430_v5 }
 0x378   :  { %v503_v10 = vpop.f32.mrf.mxu1 }
 0x379   :  { %v504_v12 = vadd.f32 %v503_v10, %v433_v9 }
 0x37a   :  { %v616_v13 = vpop.f32.mrf.mxu1 }
 0x37b   :  { %v509_v14 = vadd.f32 %v508_v11, %v504_v12 }
 0x37d   :  { %510 = vst [vmem:[#allocation7] sm:$0x1] %v509_v14 }
 0x37e   :  { %700 = shalt.err (!%p697_p0)
}
 0x37f   :  { %520 = dma.vmem_to_hbm [thread:$0]  %s518_s19, 16, %s855_s7, [#allocation4]  }
 0x380   :  { %713 = dma.done.wait [#allocation4], 16  }
 0x381   :  { %714 = vsyncadd [#allocation4], 4294967280 }
 0x382   :  { %524 = vsyncpa [#allocation3], 1 }
 0x383   :  { %525 = vsyncpa [#allocation4], 1 }
 0x384   :  { %526 = vsyncpa [#allocation5], 1 }

</bundles_post_ra>
